<compile_context>
chip_gen: v7x
topology: tpu7x:2x2x1
jax: 0.10.0
libtpu: 0.0.40
codegen_flags: <defaults>
</compile_context>

<pallas_src>
import functools

import jax
import jax.numpy as jnp
import numpy as np
from jax.experimental import pallas as pl
from jax.experimental.pallas import tpu as pltpu


def _round_up(x, m):
    return ((x + m - 1) // m) * m


def _cspn_kernel(gw_ref, hnp_ref, h0_ref, out_ref, *, k, r, tile_h, w_lanes, half):
    """One (batch, H-tile) grid step.

    gw_ref  : (1, k*k, tile_h, w_lanes)        halo-free, lane-dense guide weights
    hnp_ref : (1, h_pad + 2r, w_lanes + 2r)    zero-padded hn plane (batch-resident)
    h0_ref  : (1, tile_h, w_lanes)             h0 rows of this tile (centre tap)
    out_ref : (1, tile_h, w_lanes)
    """
    it = pl.program_id(1)
    row0 = pl.multiple_of(it * tile_h, 8)

    # One halo-strip load; hoist the horizontal (lane) shifts out of the tap
    # loop: k lane-offset slices instead of k*k.
    strip = hnp_ref[0, pl.ds(row0, tile_h + 2 * r), :]      # (tile_h+2r, w_lanes+2r)
    col_shifted = [
        jax.lax.slice(strip, (0, 2 * r - j), (tile_h + 2 * r, 2 * r - j + w_lanes))
        for j in range(k)
    ]                                                        # each (tile_h+2r, w_lanes)

    acc = jnp.zeros((tile_h, w_lanes), jnp.float32)
    for t in range(k * k):                                   # unrolled tap loop
        i, j = t // k, t % k
        if t == half:
            # centre tap: src[y + r - r, x + r - r] == h0[y, x] (never OOB)
            src = h0_ref[0].astype(jnp.float32)
        else:
            src = jax.lax.slice(
                col_shifted[j], (2 * r - i, 0), (2 * r - i + tile_h, w_lanes)
            ).astype(jnp.float32)
        acc = acc + gw_ref[0, t].astype(jnp.float32) * src

    out_ref[0] = acc.astype(out_ref.dtype)


def cspn_forward(guide_weight, hn, h0, kernel_size, *,
                 cast_guide_to_bf16=False, tile_h=None):
    """Pallas implementation of CSPN.forward. Returns (B, 1, H, W)."""
    k = kernel_size
    assert k % 2 == 1 and k >= 3, "CSPN kernel_size must be odd (3 / 5 / 7)"
    r = (k - 1) // 2
    half = (k * k - 1) // 2

    B, K2, Hp, Wp = guide_weight.shape
    assert K2 == k * k
    _, _, H, W = hn.shape
    assert hn.shape == h0.shape == (B, 1, H, W)
    assert Hp == H + 2 * r and Wp == W + 2 * r

    # Output keeps the f32 promotion of the original inputs even if the guide
    # weights are internally carried as bf16.
    out_dtype = jnp.promote_types(jnp.promote_types(guide_weight.dtype, hn.dtype),
                                  h0.dtype)

    # ---- wrapper-side layout plumbing (one cheap XLA fusion per array) ------
    w_lanes = _round_up(max(W, 128), 128)                    # lane-dense width
    gw_dtype = jnp.bfloat16 if cast_guide_to_bf16 else guide_weight.dtype
    bytes_per = jnp.dtype(gw_dtype).itemsize

    if tile_h is None:
        # Keep one guide-weight buffer around <= ~1 MiB (Pallas double-buffers);
        # safe for v5e's 16 MiB scoped default and v7x's 64 MiB physical VMEM.
        t = (1 << 20) // (K2 * w_lanes * bytes_per)
        t = max(8, min(64, (t // 8) * 8))
        tile_h = min(t, _round_up(H, 8))
    assert tile_h % 8 == 0
    h_pad = _round_up(H, tile_h)
    n_h = h_pad // tile_h

    # Guide weights: crop the halo (no per-tap crop in-kernel), pad to a
    # lane-dense (h_pad, w_lanes) slab, optionally cast to bf16 (halves the
    # dominant share of HBM traffic).
    gw = guide_weight[:, :, r:r + H, r:r + W].astype(gw_dtype)
    gw = jnp.pad(gw, ((0, 0), (0, 0), (0, h_pad - H), (0, w_lanes - W)))

    # hn: zero-pad by r (propagation boundary) plus alignment padding; the full
    # plane stays VMEM-resident per batch (small next to the k^2 guide planes).
    hn_p = jnp.pad(hn[:, 0], ((0, 0), (r, r + h_pad - H), (r, r + w_lanes - W)))
    # h0 is only read at the centre tap (zero shift) -> no halo needed.
    h0_p = jnp.pad(h0[:, 0], ((0, 0), (0, h_pad - H), (0, w_lanes - W)))

    kern = functools.partial(_cspn_kernel, k=k, r=r, tile_h=tile_h,
                             w_lanes=w_lanes, half=half)
    out = pl.pallas_call(
        kern,
        out_shape=jax.ShapeDtypeStruct((B, h_pad, w_lanes), out_dtype),
        grid_spec=pltpu.PrefetchScalarGridSpec(
            num_scalar_prefetch=0,
            grid=(B, n_h),
            in_specs=[
                pl.BlockSpec((1, K2, tile_h, w_lanes), lambda b, it: (b, 0, it, 0)),
                pl.BlockSpec((1, h_pad + 2 * r, w_lanes + 2 * r),
                             lambda b, it: (b, 0, 0)),
                pl.BlockSpec((1, tile_h, w_lanes), lambda b, it: (b, it, 0)),
            ],
            out_specs=pl.BlockSpec((1, tile_h, w_lanes), lambda b, it: (b, it, 0)),
        ),
        compiler_params=pltpu.CompilerParams(
            dimension_semantics=("parallel", "parallel"),
            vmem_limit_bytes=32 * 1024 * 1024,
        ),
    )(gw, hn_p, h0_p)

    return out[:, None, :H, :W]                              # (B, 1, H, W)


def cspn_reference(guide_weight, hn, h0, kernel_size):
    """Pure-JAX transliteration of the PyTorch forward (for verification)."""
    k = kernel_size
    r = (k - 1) // 2
    half = (k * k - 1) // 2
    stacks = []
    for t in range(k * k):
        i, j = t // k, t % k
        src = h0 if t == half else hn
        padded = jnp.pad(src, ((0, 0), (0, 0), (i, k - 1 - i), (j, k - 1 - j)))
        stacks.append(padded)
    guide_result = jnp.concatenate(stacks, axis=1)
    s = jnp.sum(guide_weight * guide_result, axis=1)
    s = s[:, r:-r, r:-r]
    return s[:, None]


if __name__ == "__main__":
    base_key = jax.random.PRNGKey(0)

    for kernel_size in (3, 5):
        B, H, W = 2, 16, 16
        K2 = kernel_size * kernel_size
        r = (kernel_size - 1) // 2
        Hp, Wp = H + 2 * r, W + 2 * r

        kk = jax.random.fold_in(base_key, kernel_size)
        k1, k2, k3 = jax.random.split(kk, 3)
        guide_weight = jax.random.normal(k1, (B, K2, Hp, Wp), dtype=jnp.float32)
        hn = jax.random.normal(k2, (B, 1, H, W), dtype=jnp.float32)
        h0 = jax.random.normal(k3, (B, 1, H, W), dtype=jnp.float32)

        # f32 path: exact module semantics.
        out = jax.block_until_ready(cspn_forward(guide_weight, hn, h0, kernel_size))
        ref = jax.block_until_ready(cspn_reference(guide_weight, hn, h0, kernel_size))
        np.testing.assert_allclose(np.asarray(out), np.asarray(ref),
                                   rtol=1e-5, atol=1e-5)
        assert out.shape == (B, 1, H, W)

        # bf16 guide-weight path (halves guide HBM traffic); compared against
        # the same math applied to bf16-rounded weights, f32 accumulation.
        out_bf16 = jax.block_until_ready(
            cspn_forward(guide_weight, hn, h0, kernel_size, cast_guide_to_bf16=True))
        ref_bf16 = jax.block_until_ready(cspn_reference(
            guide_weight.astype(jnp.bfloat16).astype(jnp.float32), hn, h0, kernel_size))
        np.testing.assert_allclose(np.asarray(out_bf16), np.asarray(ref_bf16),
                                   rtol=1e-4, atol=1e-4)

    print("KERNEL_OK")
</pallas_src>

<mosaic_0001>
module attributes {stable_mosaic.version = 11 : i64} {
  func.func @_cspn_kernel(%arg0: i32, %arg1: i32, %arg2: memref<1x9x16x128xf32, #tpu.memory_space<vmem>>, %arg3: memref<1x18x130xf32, #tpu.memory_space<vmem>>, %arg4: memref<1x16x128xf32, #tpu.memory_space<vmem>>, %arg5: memref<1x16x128xf32, #tpu.memory_space<vmem>>) attributes {dimension_semantics = [#tpu.dimension_semantics<parallel>, #tpu.dimension_semantics<parallel>], iteration_bounds = array<i64: 2, 1>, scalar_prefetch = 0 : i64, scratch_operands = 0 : i64, tpu.core_type = #tpu.core_type<tc>, window_params = [{transform_indices = @transform_0, window_bounds = array<i64: 1, 9, 16, 128>}, {transform_indices = @transform_1, window_bounds = array<i64: 1, 18, 130>}, {transform_indices = @transform_2, window_bounds = array<i64: 1, 16, 128>}, {transform_indices = @transform_3, window_bounds = array<i64: 1, 16, 128>}]} {
    %c16_i32 = arith.constant 16 : i32
    %0 = arith.muli %arg1, %c16_i32 : i32
    %1 = tpu.assume_multiple %0, 8 : i32
    %c0 = arith.constant 0 : index
    %2 = arith.index_cast %1 : i32 to index
    %c0_0 = arith.constant 0 : index
    %3 = vector.load %arg3[%c0, %2, %c0_0] : memref<1x18x130xf32, #tpu.memory_space<vmem>>, vector<1x18x130xf32>
    %4 = vector.shape_cast %3 : vector<1x18x130xf32> to vector<18x130xf32>
    %5 = vector.extract_strided_slice %4 {offsets = [0, 2], sizes = [18, 128], strides = [1, 1]} : vector<18x130xf32> to vector<18x128xf32>
    %6 = vector.extract_strided_slice %4 {offsets = [0, 1], sizes = [18, 128], strides = [1, 1]} : vector<18x130xf32> to vector<18x128xf32>
    %7 = vector.extract_strided_slice %4 {offsets = [0, 0], sizes = [18, 128], strides = [1, 1]} : vector<18x130xf32> to vector<18x128xf32>
    %cst = arith.constant 0.000000e+00 : f32
    %8 = vector.broadcast %cst : f32 to vector<16x128xf32>
    %9 = vector.extract_strided_slice %5 {offsets = [2, 0], sizes = [16, 128], strides = [1, 1]} : vector<18x128xf32> to vector<16x128xf32>
    %c0_1 = arith.constant 0 : index
    %c0_2 = arith.constant 0 : index
    %c0_3 = arith.constant 0 : index
    %c0_4 = arith.constant 0 : index
    %10 = vector.load %arg2[%c0_1, %c0_2, %c0_3, %c0_4] : memref<1x9x16x128xf32, #tpu.memory_space<vmem>>, vector<1x1x16x128xf32>
    %11 = vector.shape_cast %10 : vector<1x1x16x128xf32> to vector<16x128xf32>
    %12 = arith.mulf %11, %9 : vector<16x128xf32>
    %13 = arith.addf %8, %12 : vector<16x128xf32>
    %14 = vector.extract_strided_slice %6 {offsets = [2, 0], sizes = [16, 128], strides = [1, 1]} : vector<18x128xf32> to vector<16x128xf32>
    %c0_5 = arith.constant 0 : index
    %c1 = arith.constant 1 : index
    %c0_6 = arith.constant 0 : index
    %c0_7 = arith.constant 0 : index
    %15 = vector.load %arg2[%c0_5, %c1, %c0_6, %c0_7] : memref<1x9x16x128xf32, #tpu.memory_space<vmem>>, vector<1x1x16x128xf32>
    %16 = vector.shape_cast %15 : vector<1x1x16x128xf32> to vector<16x128xf32>
    %17 = arith.mulf %16, %14 : vector<16x128xf32>
    %18 = arith.addf %13, %17 : vector<16x128xf32>
    %19 = vector.extract_strided_slice %7 {offsets = [2, 0], sizes = [16, 128], strides = [1, 1]} : vector<18x128xf32> to vector<16x128xf32>
    %c0_8 = arith.constant 0 : index
    %c2 = arith.constant 2 : index
    %c0_9 = arith.constant 0 : index
    %c0_10 = arith.constant 0 : index
    %20 = vector.load %arg2[%c0_8, %c2, %c0_9, %c0_10] : memref<1x9x16x128xf32, #tpu.memory_space<vmem>>, vector<1x1x16x128xf32>
    %21 = vector.shape_cast %20 : vector<1x1x16x128xf32> to vector<16x128xf32>
    %22 = arith.mulf %21, %19 : vector<16x128xf32>
    %23 = arith.addf %18, %22 : vector<16x128xf32>
    %24 = vector.extract_strided_slice %5 {offsets = [1, 0], sizes = [16, 128], strides = [1, 1]} : vector<18x128xf32> to vector<16x128xf32>
    %c0_11 = arith.constant 0 : index
    %c3 = arith.constant 3 : index
    %c0_12 = arith.constant 0 : index
    %c0_13 = arith.constant 0 : index
    %25 = vector.load %arg2[%c0_11, %c3, %c0_12, %c0_13] : memref<1x9x16x128xf32, #tpu.memory_space<vmem>>, vector<1x1x16x128xf32>
    %26 = vector.shape_cast %25 : vector<1x1x16x128xf32> to vector<16x128xf32>
    %27 = arith.mulf %26, %24 : vector<16x128xf32>
    %28 = arith.addf %23, %27 : vector<16x128xf32>
    %c0_14 = arith.constant 0 : index
    %c0_15 = arith.constant 0 : index
    %c0_16 = arith.constant 0 : index
    %29 = vector.load %arg4[%c0_14, %c0_15, %c0_16] : memref<1x16x128xf32, #tpu.memory_space<vmem>>, vector<1x16x128xf32>
    %30 = vector.shape_cast %29 : vector<1x16x128xf32> to vector<16x128xf32>
    %c0_17 = arith.constant 0 : index
    %c4 = arith.constant 4 : index
    %c0_18 = arith.constant 0 : index
    %c0_19 = arith.constant 0 : index
    %31 = vector.load %arg2[%c0_17, %c4, %c0_18, %c0_19] : memref<1x9x16x128xf32, #tpu.memory_space<vmem>>, vector<1x1x16x128xf32>
    %32 = vector.shape_cast %31 : vector<1x1x16x128xf32> to vector<16x128xf32>
    %33 = arith.mulf %32, %30 : vector<16x128xf32>
    %34 = arith.addf %28, %33 : vector<16x128xf32>
    %35 = vector.extract_strided_slice %7 {offsets = [1, 0], sizes = [16, 128], strides = [1, 1]} : vector<18x128xf32> to vector<16x128xf32>
    %c0_20 = arith.constant 0 : index
    %c5 = arith.constant 5 : index
    %c0_21 = arith.constant 0 : index
    %c0_22 = arith.constant 0 : index
    %36 = vector.load %arg2[%c0_20, %c5, %c0_21, %c0_22] : memref<1x9x16x128xf32, #tpu.memory_space<vmem>>, vector<1x1x16x128xf32>
    %37 = vector.shape_cast %36 : vector<1x1x16x128xf32> to vector<16x128xf32>
    %38 = arith.mulf %37, %35 : vector<16x128xf32>
    %39 = arith.addf %34, %38 : vector<16x128xf32>
    %40 = vector.extract_strided_slice %5 {offsets = [0, 0], sizes = [16, 128], strides = [1, 1]} : vector<18x128xf32> to vector<16x128xf32>
    %c0_23 = arith.constant 0 : index
    %c6 = arith.constant 6 : index
    %c0_24 = arith.constant 0 : index
    %c0_25 = arith.constant 0 : index
    %41 = vector.load %arg2[%c0_23, %c6, %c0_24, %c0_25] : memref<1x9x16x128xf32, #tpu.memory_space<vmem>>, vector<1x1x16x128xf32>
    %42 = vector.shape_cast %41 : vector<1x1x16x128xf32> to vector<16x128xf32>
    %43 = arith.mulf %42, %40 : vector<16x128xf32>
    %44 = arith.addf %39, %43 : vector<16x128xf32>
    %45 = vector.extract_strided_slice %6 {offsets = [0, 0], sizes = [16, 128], strides = [1, 1]} : vector<18x128xf32> to vector<16x128xf32>
    %c0_26 = arith.constant 0 : index
    %c7 = arith.constant 7 : index
    %c0_27 = arith.constant 0 : index
    %c0_28 = arith.constant 0 : index
    %46 = vector.load %arg2[%c0_26, %c7, %c0_27, %c0_28] : memref<1x9x16x128xf32, #tpu.memory_space<vmem>>, vector<1x1x16x128xf32>
    %47 = vector.shape_cast %46 : vector<1x1x16x128xf32> to vector<16x128xf32>
    %48 = arith.mulf %47, %45 : vector<16x128xf32>
    %49 = arith.addf %44, %48 : vector<16x128xf32>
    %50 = vector.extract_strided_slice %7 {offsets = [0, 0], sizes = [16, 128], strides = [1, 1]} : vector<18x128xf32> to vector<16x128xf32>
    %c0_29 = arith.constant 0 : index
    %c8 = arith.constant 8 : index
    %c0_30 = arith.constant 0 : index
    %c0_31 = arith.constant 0 : index
    %51 = vector.load %arg2[%c0_29, %c8, %c0_30, %c0_31] : memref<1x9x16x128xf32, #tpu.memory_space<vmem>>, vector<1x1x16x128xf32>
    %52 = vector.shape_cast %51 : vector<1x1x16x128xf32> to vector<16x128xf32>
    %53 = arith.mulf %52, %50 : vector<16x128xf32>
    %54 = arith.addf %49, %53 : vector<16x128xf32>
    %c0_32 = arith.constant 0 : index
    %c0_33 = arith.constant 0 : index
    %c0_34 = arith.constant 0 : index
    %55 = vector.load %arg5[%c0_32, %c0_33, %c0_34] : memref<1x16x128xf32, #tpu.memory_space<vmem>>, vector<1x16x128xf32>
    %56 = vector.shape_cast %55 : vector<1x16x128xf32> to vector<16x128xf32>
    %57 = vector.shape_cast %54 : vector<16x128xf32> to vector<1x16x128xf32>
    tpu.vector_store %arg5[%c0_32, %c0_33, %c0_34], %57 {strides = array<i32>} : memref<1x16x128xf32, #tpu.memory_space<vmem>>, vector<1x16x128xf32>,
    return
  }
  func.func @transform_0(%arg0: i32, %arg1: i32) -> (i32, i32, i32, i32) {
    %c0_i32 = arith.constant 0 : i32
    %c0_i32_0 = arith.constant 0 : i32
    %c0_i32_1 = arith.constant 0 : i32
    return %arg0, %c0_i32, %arg1, %c0_i32_0 : i32, i32, i32, i32
  }
  func.func @transform_1(%arg0: i32, %arg1: i32) -> (i32, i32, i32) {
    %c0_i32 = arith.constant 0 : i32
    %c0_i32_0 = arith.constant 0 : i32
    %c0_i32_1 = arith.constant 0 : i32
    return %arg0, %c0_i32, %c0_i32_0 : i32, i32, i32
  }
  func.func @transform_2(%arg0: i32, %arg1: i32) -> (i32, i32, i32) {
    %c0_i32 = arith.constant 0 : i32
    %c0_i32_0 = arith.constant 0 : i32
    return %arg0, %arg1, %c0_i32 : i32, i32, i32
  }
  func.func @transform_3(%arg0: i32, %arg1: i32) -> (i32, i32, i32) {
    %c0_i32 = arith.constant 0 : i32
    %c0_i32_0 = arith.constant 0 : i32
    return %arg0, %arg1, %c0_i32 : i32, i32, i32
  }
}

</mosaic_0001>

<bundles_post_ra>
// kernel: tpu_custom_call.1
= control target key start
LH: loop header
LB: loop body
LE: loop exit
PB: predicated region body
PF: predicated region fallthrough
CT: control target
= control target key end

     0   :  { %8 = vsyncpa [#allocation3], 0  ;;  %s1076_s0 = inlined_call_operand.hbm [shape: f32[2,9,16,128], index: 0, kind: input, shape index: {}]   ;;  %s1077_s1 = inlined_call_operand.vmem [shape: f32[2,18,130], index: 1, kind: input, shape index: {}]   ;;  %s1078_s2 = inlined_call_operand.vmem [shape: f32[2,16,128], index: 2, kind: input, shape index: {}]   ;;  %s1079_s3 = inlined_call_operand.hbm [shape: f32[2,16,128], index: 3, kind: output, shape index: {}]  }
   0x1   :  { %10 = vsyncpa [#allocation3 + $0x1], 0 }
   0x2   :  { %11 = vsyncpa [#allocation4], 0 }
   0x3   :  { %13 = vsyncpa [#allocation4 + $0x1], 0  ;;  %s819_s12 = smov 0   ;;  %s821_s13 = smov 0  }
   0x4   :  { %s823_s14 = smov 0   ;;  %s825_s15 = smov 0  }
   0x5   :  { %s827_s16 = smov 0   ;;  %s829_s17 = smov 0  }
   0x6 LB: > { %s572_s18 = sadd.s32 4294967295, %s789_s17   ;;  %s573_s19 = sadd.s32 4294967294, %s789_s17   ;;  %s789_s17 = sphi %s829_s17, %s19_s17   ;;  %s785_s16 = sphi %s827_s16, %s1094_s16   ;;  %s781_s15 = sphi %s825_s15, %s1093_s15   ;;  %s777_s14 = sphi %s823_s14, %s1092_s14   ;;  %s773_s13 = sphi %s821_s13, %s1091_s13   ;;  %s769_s12 = sphi %s819_s12, %s1090_s12  }
   0x7   : > { %s31_s20 = sadd.s32 1, %s785_s16  ;;  %s40_s21 = sadd.s32 1, %s777_s14 }
   0x8   : > { %p33_p0 = scmp.ge.s32.totalorder %s31_s20, 2  ;;  %p47_p1 = scmp.ne.s32.totalorder %s777_s14, %s773_s13 }
   0x9   : > { %p48_p2 = scmp.eq.s32.totalorder %s789_s17, 0  ;;  %p53_p3 = scmp.ne.s32.totalorder %s773_s13, %s769_s12 }
   0xa   : > { %s1096_s20 = smov (%p33_p0, %s31_s20), 0  ;;  %p54_p5 = scmp.eq.s32.totalorder %s572_s18, 0 }
   0xb   : > { %p860_p4 = por %p48_p2, %p47_p1  ;;  %s35_s23 = ssub.s32 %s785_s16, %s1096_s20 }
   0xc   : > { %p133_p6 = scmp.eq.s32.totalorder %s572_s18, 1  ;;  %p38_p7 = scmp.eq.s32.totalorder %s35_s23, 0 }
   0xd   : > { %p866_p8 = por %p54_p5, %p53_p3  ;;  %p139_p10 = scmp.eq.s32.totalorder %s573_s19, 1 }
   0xe   : > { %p870_p9 = por %p133_p6, %p47_p1  ;;  %p621_p13 = scmp.lt.s32.totalorder %s789_s17, 2 }
   0xf   : > { %s875_s26 = scalar_select %p38_p7, %s777_s14, %s40_s21  }
  0x10   : > { %s1083_s25 = scalar_select %p870_p9, 1, 0 }
  0x11   : > { %p877_p11 = por %p139_p10, %p53_p3  ;;  %s159_s28 = sand.u32 1, %s777_s14  }
  0x12   : > { %s605_s29 = smul.u32 144, %s159_s28  ;;  %p887_p0 = pnand %p621_p13, %p860_p4 }
  0x13   : > { %s1084_s27 = scalar_select %p877_p11, 1, 0 }
  0x14   : > { %s606_s30 = smul.u32 2304, %s785_s16  ;;  %s163_s8 = scalar_lea.vmem [#allocation2], %s605_s29 }
  0x15   : > { %s172_s9 = sshll.u32 %s163_s8, 4  ;;  %s899_s10 = scalar_lea.sflag [#allocation3], %s159_s28  ;;  %s896_s9 = int_to_ptr.vmem [resolvable:$true] %s172_s9 }
  0x16   : > { %s894_s7 = scalar_lea.hbm %s1076_s0, %s606_s30  ;;  %p679_p3 = pneg %p887_p0 }
  0x17   : > { %s677_s11 = scalar_lea.hbm %s894_s7, 2304  ;;  %s682_s21 = scalar_lea.hbm %s1076_s0, 4608 }
  0x18   : > { %p678_p2 = scmp.ne.s32.totalorder %s894_s7, %s677_s11  ;;  %p683_p6 = scmp.lt.u32.totalorder %s894_s7, %s1076_s0 }
  0x19   : > { %p684_p7 = scmp.lt.u32.totalorder %s682_s21, %s677_s11  ;;  %p686_p13 = scmp.lt.u32.totalorder %s677_s11, %s894_s7 }
  0x1a   : > { %p680_p4 = pnand %p679_p3, %p678_p2 }
  0x1b   : > { %p685_p10 = por %p684_p7, %p683_p6 }
  0x1c   : > { %p681_p5 = pneg %p680_p4 }
  0x1d   : > { %p687_p12 = por %p686_p13, %p685_p10 }
  0x1f   : > { %p688_p1 = pnand %p687_p12, %p681_p5 }
  0x21   : > { %691 = shalt.err (!%p688_p1)
}
  0x22   : > { %s692_s28 = scalar_lea.vmem %s896_s9, 2304  ;;  %s791_s29 = smov [#allocation2]  }
  0x23   : > { %p693_p2 = scmp.ne.s32.totalorder %s896_s9, %s692_s28  ;;  %s697_s30 = sshll.u32 %s791_s29, 4  ;;  %s698_s30 = int_to_ptr.vmem [resolvable:$false] %s697_s30 }
  0x24   : > { %s699_s5 = scalar_lea.vmem %s698_s30, 4608  ;;  %p700_p9 = scmp.lt.s32.totalorder %s896_s9, %s698_s30 }
  0x25   : > { %p695_p4 = pnand %p693_p2, %p679_p3  ;;  %p701_p6 = scmp.lt.s32.totalorder %s699_s5, %s692_s28 }
  0x27   : > { %p696_p11 = pneg %p695_p4  ;;  %p702_p7 = por %p701_p6, %p700_p9 }
  0x29   : > { %p703_p10 = pnand %p702_p7, %p696_p11 }
  0x2b   : > { %706 = shalt.err (!%p703_p10)
}
  0x2c   : > { %s792_s6 = smov 128   ;;  %s793_s8 = smov 8  }
  0x2d   : > { %616 = dma.hbm_to_vmem [thread:$0]  (!%p887_p0), %s894_s7, 2304, %s896_s9, %s899_s10, %s792_s6, %s792_s6, %s793_s8  }
  0x2e   : > { %p201_p12 = scmp.lt.s32.totalorder %s789_s17, 3  ;;  %p1086_p1 = scmp.ge.s32.totalorder %s789_s17, 1 }
  0x30   : > { %p202_p3 = pnand %p1086_p1, %p201_p12 }
  0x31   : > { %s931_s11 = sand.u32 (!%p202_p3), 1, %s773_s13  }
  0x32   : > { %205 = sbr.rel (%p202_p3) target bundleno = 243 (0xf3), region = 32  ;;  %s208_s19 = scalar_lea.sflag (!%p202_p3), [#allocation3], %s931_s11 }
  0x33   : > { %s607_s18 = smul.u32 (!%p202_p3), 144, %s931_s11 }
  0x35   : > { %s935_s21 = scalar_lea.vmem (!%p202_p3), [#allocation2], %s607_s18 }
  0x39   : > { %760 = dma.done.wait (%p866_p8), %s208_s19, 2304  }
  0x3a   : > { %762 = vsyncadd (%p866_p8), %s208_s19, 4294964992  ;;  %p249_p9 = scmp.lt.s32.totalorder %s781_s15, 1  ;;  %vm285_vm0 = vcmask 1045504   ;;  %s794_s24 = smov 126   ;;  %vm345_vm1 = vcmask 1046528   ;;  %vm304_vm2 = vcmask 1031168  }
  0x3b   : > { %s795_s23 = smov 127   ;;  %vm324_vm3 = vcmask 1039360   ;;  %v582_v31 = vld [vmem:[%s935_s21 + $0x10] sm:$0xff]  ;;  %v277_v33 = vld [vmem:[%s935_s21] sm:$0xff]  ;;  %v583_v39 = vld [vmem:[%s935_s21 + $0x18] sm:$0xff]  ;;  %s578_s6 = sshll.u32 %s931_s11, 4 }
  0x3c   : > { %s943_s4 = scalar_select %p249_p9, %s781_s15, 1  ;;  %v584_v37 = vld [vmem:[%s935_s21 + $0x20] sm:$0xff]  ;;  %v278_v42 = vld [vmem:[%s935_s21 + $0x8] sm:$0xff]  ;;  %v586_v50 = vld [vmem:[%s935_s21 + $0x30] sm:$0xff] }
  0x3d   : > { %v585_v45 = vld [vmem:[%s935_s21 + $0x28] sm:$0xff]  ;;  %v588_v52 = vld [vmem:[%s935_s21 + $0x40] sm:$0xff]  ;;  %v590_v56 = vld [vmem:[%s935_s21 + $0x50] sm:$0xff]  ;;  %s604_s8 = sshll.u32 %s781_s15, 8  ;;  %s247_s18 = scalar_lea.vmem [#allocation5], %s578_s6 }
  0x3e   : > { %s608_s7 = smul.u32 48, %s943_s4  ;;  %s603_s28 = sshll.u32 %s943_s4, 4  ;;  %v587_v63 = vld [vmem:[%s935_s21 + $0x38] sm:$0xff] }
  0x3f   : > { %s262_s5 = scalar_lea.vmem %s1078_s2, %s603_s28  ;;  %s453_s19 = sshll.u32 %s247_s18, 4  ;;  %s1027_s19 = int_to_ptr.vmem [resolvable:$true] %s453_s19 }
  0x40   : > { %s253_s22 = scalar_lea.vmem %s1077_s1, %s608_s7  ;;  %v372_v51 = vld [vmem:[%s262_s5] sm:$0xff]  ;;  %s438_s9 = scalar_lea.sflag [#allocation4], %s931_s11 }
  0x41   : > { %v949_v0 = vld [vmem:[%s253_s22 + $0x10] sm:$0xff]  ;;  %v275_v1 = vld [vmem:[%s253_s22 + $0x20] sm:$0x3]  ;;  %v274_v5 = vld [vmem:[%s253_s22 + $0x18] sm:$0xff]  ;;  %v377_v59 = vmul.f32 %v588_v52, %v372_v51  ;;  %s707_s10 = scalar_lea.vmem %s1027_s19, 256  ;;  %p1087_p11 = scmp.ne.s32.totalorder %s1083_s25, 0 }
  0x42   : > { %v287_v2 = vrot.slane %v949_v0, 2  ;;  %v292_v3 = vrot.slane %v275_v1, 2  ;;  %v952_v4 = vld [vmem:[%s253_s22] sm:$0xff]  ;;  %v276_v7 = vld [vmem:[%s253_s22 + $0x28] sm:$0x3]  ;;  %v290_v8 = vrot.slane %v274_v5, 2  ;;  %p708_p8 = scmp.ne.s32.totalorder %s1027_s19, %s707_s10 }
  0x43   : > { %v286_v6 = vrot.slane %v952_v4, 2  ;;  %v272_v9 = vld [vmem:[%s253_s22 + $0x8] sm:$0xff]  ;;  %v294_v11 = vrot.slane %v276_v7, 2  ;;  %v350_v17 = vrot.slane %v274_v5, 1  ;;  %v346_v18 = vrot.slane %v952_v4, 1  ;;  %s796_s15 = smov [#allocation5]  }
  0x44   : > { %v956_v10 = vsel %vm285_vm0, %v287_v2, %v292_v3  ;;  %v289_v12 = vrot.slane %v272_v9, 2  ;;  %v349_v16 = vrot.slane %v272_v9, 1  ;;  %v347_v19 = vrot.slane %v949_v0, 1  ;;  %p709_p0 = pnand %p708_p8, %p1087_p11  ;;  %s711_s22 = sshll.u32 %s796_s15, 4  ;;  %s712_s22 = int_to_ptr.vmem [resolvable:$false] %s711_s22 }
  0x45   : > { %300 = vrot.lane.b32.xlu1 %v956_v10, %s794_s24  ;;  %v288_v13 = vsel %vm285_vm0, %v286_v6, %v287_v2  ;;  %v295_v14 = vsel %vm285_vm0, %v290_v8, %v294_v11  ;;  %v354_v21 = vrot.slane %v276_v7, 1  ;;  %v352_v23 = vrot.slane %v275_v1, 1  ;;  %v373_v1 = vld [vmem:[%s262_s5 + $0x8] sm:$0xff]  ;;  %p714_p13 = scmp.lt.s32.totalorder %s1027_s19, %s712_s22 }
  0x46   : > { %296 = vrot.lane.b32.xlu0 %v288_v13, %s794_s24  ;;  %v291_v15 = vsel %vm285_vm0, %v289_v12, %v290_v8  ;;  %v351_v20 = vsel %vm345_vm1, %v349_v16, %v350_v17  ;;  %v348_v22 = vsel %vm345_vm1, %v346_v18, %v347_v19  ;;  %v338_v46 = vmul.f32 %v584_v37, %v288_v13  ;;  %v589_v2 = vld [vmem:[%s935_s21 + $0x48] sm:$0xff]  ;;  %v591_v7 = vld [vmem:[%s935_s21 + $0x58] sm:$0xff]  ;;  %p710_p5 = pneg %p709_p0 }
  0x47   : > { %v355_v24 = vsel %vm345_vm1, %v350_v17, %v354_v21  ;;  %v971_v25 = vsel %vm345_vm1, %v347_v19, %v352_v23  ;;  %v339_v55 = vmul.f32 %v585_v45, %v956_v10  ;;  %v386_v3 = vmul.f32 %v590_v56, %v348_v22  ;;  %v592_v19 = vld [vmem:[%s935_s21 + $0x60] sm:$0xff]  ;;  %v595_v37 = vld [vmem:[%s935_s21 + $0x78] sm:$0xff] }
  0x48   : > { %v378_v11 = vmul.f32 %v589_v2, %v373_v1 }
  0x49   : > { %302 = vrot.lane.b32.xlu1 %v295_v14, %s794_s24 }
  0x4a   : > { %298 = vrot.lane.b32.xlu0 %v291_v15, %s794_s24 }
  0x4d   : > { %318 = vrot.lane.b32.xlu1 %v291_v15, %s795_s23 }
  0x4e   : > { %316 = vrot.lane.b32.xlu0 %v288_v13, %s795_s23 }
  0x51   : > { %322 = vrot.lane.b32.xlu1 %v295_v14, %s795_s23  ;;  %v387_v14 = vmul.f32 %v591_v7, %v971_v25 }
  0x52   : > { %320 = vrot.lane.b32.xlu0 %v956_v10, %s795_s23 }
  0x55   : > { %358 = vrot.lane.b32.xlu1 %v351_v20, %s794_s24 }
  0x56   : > { %356 = vrot.lane.b32.xlu0 %v348_v22, %s794_s24 }
  0x59   : > { %362 = vrot.lane.b32.xlu1 %v355_v24, %s794_s24 }
  0x5a   : > { %360 = vrot.lane.b32.xlu0 %v971_v25, %s794_s24  ;;  %v596_v25 = vld [vmem:[%s935_s21 + $0x80] sm:$0xff] }
  0x5d   : > { %395 = vrot.lane.b32.xlu1 %v272_v9, %s794_s24 }
  0x5e   : > { %393 = vrot.lane.b32.xlu0 %v952_v4, %s794_s24 }
  0x61   : > { %399 = vrot.lane.b32.xlu1 %v274_v5, %s794_s24 }
  0x62   : > { %397 = vrot.lane.b32.xlu0 %v949_v0, %s794_s24  ;;  %s713_s24 = scalar_lea.vmem %s712_s22, 512 }
  0x63   : > { %p715_p2 = scmp.lt.s32.totalorder %s713_s24, %s707_s10 }
  0x65   : > { %414 = vrot.lane.b32.xlu1 %v272_v9, %s795_s23  ;;  %p716_p4 = por %p715_p2, %p714_p13 }
  0x66   : > { %412 = vrot.lane.b32.xlu0 %v952_v4, %s795_s23 }
  0x67   : > { %p717_p6 = pnand %p716_p4, %p710_p5 }
  0x69   : > { %418 = vrot.lane.b32.xlu1 %v274_v5, %s795_s23 }
  0x6a   : > { %416 = vrot.lane.b32.xlu0 %v949_v0, %s795_s23 }
  0xb7   : > { %v301_v26 = vpop.permute.xlu1 %300 }
  0xb8   : > { %v297_v27 = vpop.permute.xlu0 %296 }
  0xbb   : > { %v303_v28 = vpop.permute.xlu1 %302 }
  0xbc   : > { %v299_v29 = vpop.permute.xlu0 %298  ;;  %v306_v43 = vsel %vm304_vm2, %v301_v26, %v303_v28  ;;  %v593_v26 = vld [vmem:[%s935_s21 + $0x68] sm:$0xff] }
  0xbd   : > { %v305_v34 = vsel %vm304_vm2, %v297_v27, %v299_v29  ;;  %v310_v53 = vmul.f32 %v306_v43, %v278_v42  ;;  %v594_v29 = vld [vmem:[%s935_s21 + $0x70] sm:$0xff] }
  0xbe   : > { %v309_v40 = vmul.f32 %v305_v34, %v277_v33  ;;  %v431_v34 = vmul.f32 %v596_v25, %v952_v4 }
  0xbf   : > { %v319_v30 = vpop.permute.xlu1 %318 }
  0xc0   : > { %v317_v32 = vpop.permute.xlu0 %316 }
  0xc1   : > { %v325_v35 = vsel %vm324_vm3, %v317_v32, %v319_v30 }
  0xc2   : > { %v329_v36 = vmul.f32 %v582_v31, %v325_v35 }
  0xc3   : > { %v323_v38 = vpop.permute.xlu1 %322 }
  0xc4   : > { %v321_v41 = vpop.permute.xlu0 %320  ;;  %v331_v47 = vadd.f32 %v329_v36, %v309_v40 }
  0xc5   : > { %v326_v44 = vsel %vm324_vm3, %v321_v41, %v323_v38  ;;  %v597_v38 = vld [vmem:[%s935_s21 + $0x88] sm:$0xff]  ;;  %s1025_s21 = scalar_lea.hbm %s1079_s3, %s604_s8 }
  0xc6   : > { %v330_v48 = vmul.f32 %v583_v39, %v326_v44  ;;  %v340_v60 = vadd.f32 %v338_v46, %v331_v47  ;;  %v432_v44 = vmul.f32 %v597_v38, %v949_v0 }
  0xc7   : > { %v359_v49 = vpop.permute.xlu1 %358 }
  0xc8   : > { %v357_v54 = vpop.permute.xlu0 %356  ;;  %v332_v58 = vadd.f32 %v330_v48, %v310_v53 }
  0xc9   : > { %v364_v57 = vsel %vm304_vm2, %v357_v54, %v359_v49 }
  0xca   : > { %v368_v61 = vmul.f32 %v586_v50, %v364_v57  ;;  %v341_v10 = vadd.f32 %v339_v55, %v332_v58 }
  0xcb   : > { %v363_v62 = vpop.permute.xlu1 %362 }
  0xcc   : > { %v370_v5 = vadd.f32 %v368_v61, %v340_v60  ;;  %v361_v6 = vpop.permute.xlu0 %360 }
  0xcd   : > { %v365_v8 = vsel %vm304_vm2, %v361_v6, %v363_v62 }
  0xce   : > { %v379_v9 = vadd.f32 %v377_v59, %v370_v5  ;;  %v369_v12 = vmul.f32 %v587_v63, %v365_v8 }
  0xcf   : > { %v396_v13 = vpop.permute.xlu1 %395 }
  0xd0   : > { %v371_v15 = vadd.f32 %v369_v12, %v341_v10  ;;  %v394_v16 = vpop.permute.xlu0 %393  ;;  %v388_v17 = vadd.f32 %v386_v3, %v379_v9 }
  0xd1   : > { %v401_v20 = vsel %vm304_vm2, %v394_v16, %v396_v13 }
  0xd2   : > { %v380_v18 = vadd.f32 %v378_v11, %v371_v15  ;;  %v405_v24 = vmul.f32 %v592_v19, %v401_v20 }
  0xd3   : > { %v400_v21 = vpop.permute.xlu1 %399 }
  0xd4   : > { %v389_v22 = vadd.f32 %v387_v14, %v380_v18  ;;  %v398_v23 = vpop.permute.xlu0 %397  ;;  %v407_v32 = vadd.f32 %v405_v24, %v388_v17 }
  0xd5   : > { %v402_v27 = vsel %vm304_vm2, %v398_v23, %v400_v21 }
  0xd6   : > { %v406_v33 = vmul.f32 %v593_v26, %v402_v27 }
  0xd7   : > { %v415_v28 = vpop.permute.xlu1 %414 }
  0xd8   : > { %v413_v30 = vpop.permute.xlu0 %412  ;;  %v408_v42 = vadd.f32 %v406_v33, %v389_v22 }
  0xd9   : > { %v420_v31 = vsel %vm324_vm3, %v413_v30, %v415_v28 }
  0xda   : > { %v424_v35 = vmul.f32 %v594_v29, %v420_v31 }
  0xdb   : > { %v419_v36 = vpop.permute.xlu1 %418 }
  0xdc   : > { %v426_v39 = vadd.f32 %v424_v35, %v407_v32  ;;  %v417_v40 = vpop.permute.xlu0 %416 }
  0xdd   : > { %v421_v41 = vsel %vm324_vm3, %v417_v40, %v419_v36 }
  0xde   : > { %v433_v43 = vadd.f32 %v431_v34, %v426_v39  ;;  %v425_v45 = vmul.f32 %v595_v37, %v421_v41 }
  0xe0   : > { %435 = vst [vmem:[%s247_s18] sm:$0xff] %v433_v43  ;;  %v427_v4 = vadd.f32 %v425_v45, %v408_v42 }
  0xe2   : > { %v434_v46 = vadd.f32 %v432_v44, %v427_v4 }
  0xe4   : > { %436 = vst [vmem:[%s247_s18 + $0x8] sm:$0xff] %v434_v46 }
  0xe5   : > { %720 = shalt.err (!%p717_p6)
}
  0xe6   : > { %s721_s23 = scalar_lea.hbm %s1025_s21, 256  ;;  %s725_s30 = scalar_lea.hbm %s1079_s3, 512 }
  0xe7   : > { %p722_p7 = scmp.ne.s32.totalorder %s1025_s21, %s721_s23  ;;  %p726_p1 = scmp.lt.u32.totalorder %s1025_s21, %s1079_s3 }
  0xe8   : > { %p727_p3 = scmp.lt.u32.totalorder %s725_s30, %s721_s23  ;;  %p729_p8 = scmp.lt.u32.totalorder %s721_s23, %s1025_s21 }
  0xe9   : > { %p723_p10 = pnand %p722_p7, %p1087_p11 }
  0xea   : > { %p728_p9 = por %p727_p3, %p726_p1 }
  0xeb   : > { %p724_p12 = pneg %p723_p10 }
  0xec   : > { %p730_p0 = por %p729_p8, %p728_p9 }
  0xee   : > { %p731_p5 = pnand %p730_p0, %p724_p12 }
  0xf0   : > { %734 = shalt.err (!%p731_p5)
}
  0xf1   : > { %s797_s8 = smov 128   ;;  %s798_s18 = smov 8  }
  0xf2   : > { %611 = dma.vmem_to_hbm [thread:$0]  (%p1087_p11), %s1027_s19, 256, %s1025_s21, %s438_s9, %s797_s8, %s797_s8, %s798_s18  }
  0xf3 PF: > { %s468_s4 = sand.u32 1, %s769_s12   ;;  %p1088_p13 = scmp.ne.s32.totalorder %s1084_s27, 0 }
  0xf4   : > { %p1089_p2 = scmp.ge.s32.totalorder %s789_s17, 2  ;;  %s469_s7 = scalar_lea.sflag [#allocation4], %s468_s4 }
  0xf6   : > { %p618_p4 = pnand %p1089_p2, %p1088_p13 }
  0xf8   : > { %764 = dma.done.wait (!%p618_p4), %s469_s7, 256  }
  0xf9   : > { %766 = vsyncadd (!%p618_p4), %s469_s7, 4294967040  ;;  %s19_s17 = sadd.s32 1, %s789_s17   ;;  %s1090_s12 = smov %s773_s13 }
  0xfa   : > { %p16_p6 = scmp.ge.s32.totalorder %s19_s17, 4   ;;  %s1091_s13 = smov %s777_s14 }
  0xfb   : > { %s1092_s14 = smov %s875_s26  ;;  %s1093_s15 = smov %s785_s16 }
  0xfc   : > { %s1094_s16 = smov %s1096_s20  ;;  %18 = sbr.rel (!%p16_p6) target bundleno = 6 (0x6), region = 92 }
 0x103   :  { %474 = vsyncpa [#allocation3], 1 }
 0x104   :  { %476 = vsyncpa [#allocation3 + $0x1], 1 }
 0x105   :  { %477 = vsyncpa [#allocation4], 1 }
 0x106   :  { %479 = vsyncpa [#allocation4 + $0x1], 1 }

</bundles_post_ra>
